<compile_context>
chip_gen: v7x
topology: tpu7x:2x2x1
jax: 0.10.0
libtpu: 0.0.40
codegen_flags: <defaults>
</compile_context>

<pallas_src>
import jax
import jax.numpy as jnp
from jax.experimental import pallas as pl
from jax.experimental.pallas import tpu as pltpu


def _decoder_kernel(x_ref,
                    w_s1_ref, b_s1_ref,   # fused [conv1(padded) ; linear] weights/biases
                    w2_ref, b2_ref,       # conv2, zero-padded to (c_pad, c_pad)
                    w3_ref, b3_ref,       # conv3, zero-padded cols to (C_feat, c_pad)
                    o_ref):
    """One (C, tn) pixel tile: fused linear + nonlinear branches, summed.

    Channels live on sublanes, pixels on lanes, so every load/store is
    lane-dense and every dot is W(out,in) @ x(in,pixels) on the MXU with f32
    accumulation.
    """
    c_split = w2_ref.shape[1]                                  # c_pad (multiple of 8)
    x = x_ref[...]                                             # (C_code, tn)

    # Stage 1: single MXU pass over the shared input for both branches.
    s1 = jnp.dot(w_s1_ref[...], x,
                 preferred_element_type=jnp.float32) + b_s1_ref[...]
    h = jnp.maximum(s1[:c_split, :], 0.0)                      # (c_pad, tn) aligned split
    y_lin = s1[c_split:, :]                                    # (C_feat, tn) aligned split

    # Remaining nonlinear branch: conv2 -> relu -> conv3.
    h = jnp.maximum(
        jnp.dot(w2_ref[...], h.astype(w2_ref.dtype),
                preferred_element_type=jnp.float32) + b2_ref[...], 0.0)
    y_nl = jnp.dot(w3_ref[...], h.astype(w3_ref.dtype),
                   preferred_element_type=jnp.float32) + b3_ref[...]

    o_ref[...] = (y_lin + y_nl).astype(o_ref.dtype)


def _round_up(n, m):
    return -(-n // m) * m


def _pad_to(a, rows=None, cols=None):
    """Zero-pad a 2-D array to (rows, cols) (None = keep)."""
    r, c = a.shape
    rows = r if rows is None else rows
    cols = c if cols is None else cols
    if rows == r and cols == c:
        return a
    return jnp.pad(a, ((0, rows - r), (0, cols - c)))


def _choose_pixel_tile(hw, desired, per_lane_bytes, budget=40 << 20):
    """Pick a lane-axis tile satisfying the (8,128) BlockSpec rule and VMEM budget."""
    if hw <= desired:
        return hw                                   # one block == full pixel axis
    tn = max(128, (desired // 128) * 128)           # multiple of 128; cdiv grid handles tail
    while tn > 128 and tn * per_lane_bytes > budget:
        tn //= 2                                    # shrink (stays a multiple of 128)
    return tn


def _vmem_limit_bytes(tn, c_code, c_pad, c_feat, itemsize):
    """Explicit VMEM budget (double-buffered tiles + resident weights + f32 temps).

    Keeps us safe on v7x (64 MiB physical) while raising v5e's 16 MiB default.
    """
    tiles = 2 * 2 * tn * (c_code + c_feat) * itemsize          # in/out, double-buffered
    weights = 2 * 4 * ((c_pad + c_feat) * c_code + c_pad * c_pad
                       + c_feat * c_pad + 2 * (c_pad + c_feat))
    scratch = 4 * tn * (3 * c_pad + 3 * c_feat)                # f32 intermediates
    est = int(1.5 * (tiles + weights + scratch)) + (2 << 20)
    return min(max(est, 32 << 20), 48 << 20)


def decoder_forward(x_nchw, params, *, pixel_tile=2048):
    """x_nchw: (B, code_channels, H, W).  Returns (B, feat_channels, H, W)."""
    B, C_code, H, W = x_nchw.shape
    wl, bl = params["wl"], params["bl"]   # (C_feat, C_code), (C_feat, 1)
    w1, b1 = params["w1"], params["b1"]   # (C_code, C_code), (C_code, 1)
    w2, b2 = params["w2"], params["b2"]   # (C_code, C_code), (C_code, 1)
    w3, b3 = params["w3"], params["b3"]   # (C_feat, C_code), (C_feat, 1)
    C_feat = wl.shape[0]
    HW = H * W

    # Sublane-align the conv1/conv2 block so the stage-1 split needs no relayout.
    c_pad = _round_up(C_code, 8)

    itemsize = x_nchw.dtype.itemsize
    per_lane_bytes = 2 * 2 * (C_code + C_feat) * itemsize + 4 * (3 * c_pad + 3 * C_feat)
    tn = _choose_pixel_tile(HW, pixel_tile, per_lane_bytes)
    grid = (B, pl.cdiv(HW, tn))           # both axes independent (megacore-friendly)

    # Channels-major view: pure reshape, no HBM transpose.
    x_flat = x_nchw.reshape(B, C_code, HW)

    # Stage-1 fusion: [conv1 (rows padded to c_pad) ; linear] share the same input.
    w1p = _pad_to(w1, rows=c_pad)                                # (c_pad, C_code)
    b1p = _pad_to(b1, rows=c_pad)
    w_s1 = jnp.concatenate([w1p, wl], axis=0)                    # (c_pad+C_feat, C_code)
    b_s1 = jnp.concatenate([b1p, bl], axis=0).astype(jnp.float32)
    # conv2: zero cols absorb padded h rows, zero rows keep h2 rows aligned.
    w2p = _pad_to(w2, rows=c_pad, cols=c_pad)                    # (c_pad, c_pad)
    b2p = _pad_to(b2, rows=c_pad).astype(jnp.float32)
    # conv3: zero cols absorb padded h2 rows.
    w3p = _pad_to(w3, cols=c_pad)                                # (C_feat, c_pad)
    b3f = b3.astype(jnp.float32)

    full = lambda b, j: (0, 0)   # weights/biases: single block, resident across grid

    out_flat = pl.pallas_call(
        _decoder_kernel,
        out_shape=jax.ShapeDtypeStruct((B, C_feat, HW), x_nchw.dtype),
        grid_spec=pltpu.PrefetchScalarGridSpec(
            num_scalar_prefetch=0,
            grid=grid,
            in_specs=[
                # x tile: batch squeezed, channels on sublanes, pixels on lanes.
                pl.BlockSpec((None, C_code, tn), lambda b, j: (b, 0, j)),
                pl.BlockSpec(w_s1.shape, full), pl.BlockSpec(b_s1.shape, full),
                pl.BlockSpec(w2p.shape, full), pl.BlockSpec(b2p.shape, full),
                pl.BlockSpec(w3p.shape, full), pl.BlockSpec(b3f.shape, full),
            ],
            # Lane-dense output: pixels (multiple of 128 / full extent) on lanes.
            out_specs=pl.BlockSpec((None, C_feat, tn), lambda b, j: (b, 0, j)),
        ),
        compiler_params=pltpu.CompilerParams(
            dimension_semantics=("parallel", "parallel"),
            vmem_limit_bytes=_vmem_limit_bytes(tn, C_code, c_pad, C_feat, itemsize),
        ),
    )(x_flat, w_s1, b_s1, w2p, b2p, w3p, b3f)

    # (B, C_feat, HW) -> NCHW: pure reshape, no transpose.
    return out_flat.reshape(B, C_feat, H, W)


def init_params(key, code_channels, feat_channels):
    """Synthetic weights in PyTorch Conv2d layout (C_out, C_in) + (C_out, 1) bias."""
    ks = jax.random.split(key, 8)
    w = lambda k, cout, cin: jax.random.normal(k, (cout, cin), jnp.float32) * 0.1
    b = lambda k, cout: jax.random.normal(k, (cout, 1), jnp.float32) * 0.01
    return {
        "wl": w(ks[0], feat_channels, code_channels), "bl": b(ks[1], feat_channels),
        "w1": w(ks[2], code_channels, code_channels), "b1": b(ks[3], code_channels),
        "w2": w(ks[4], code_channels, code_channels), "b2": b(ks[5], code_channels),
        "w3": w(ks[6], feat_channels, code_channels), "b3": b(ks[7], feat_channels),
    }


def decoder_ref(x_nchw, p):
    """Pure-JAX reference (NCHW in/out), same math as the PyTorch module."""
    def conv1x1(w, b, t):
        return jnp.einsum('oc,bchw->bohw', w, t) + b.reshape(1, -1, 1, 1)
    y_lin = conv1x1(p["wl"], p["bl"], x_nchw)
    h = jnp.maximum(conv1x1(p["w1"], p["b1"], x_nchw), 0.0)
    h = jnp.maximum(conv1x1(p["w2"], p["b2"], h), 0.0)
    return y_lin + conv1x1(p["w3"], p["b3"], h)


if __name__ == "__main__":
    B, code_channels, feat_channels, H, W = 2, 4, 8, 16, 16

    key = jax.random.PRNGKey(0)
    k_x, k_p = jax.random.split(key)
    x = jax.random.normal(k_x, (B, code_channels, H, W), jnp.float32)
    params = init_params(k_p, code_channels, feat_channels)

    out = jax.block_until_ready(decoder_forward(x, params))

    ref = decoder_ref(x, params)
    assert out.shape == (B, feat_channels, H, W)
    assert jnp.allclose(out, ref, atol=1e-5, rtol=1e-5)

    print("KERNEL_OK")
</pallas_src>

<mosaic_0001>
module attributes {stable_mosaic.version = 11 : i64} {
  func.func @_decoder_kernel(%arg0: i32, %arg1: i32, %arg2: memref<1x4x256xf32, #tpu.memory_space<vmem>>, %arg3: memref<16x4xf32, #tpu.memory_space<vmem>>, %arg4: memref<16x1xf32, #tpu.memory_space<vmem>>, %arg5: memref<8x8xf32, #tpu.memory_space<vmem>>, %arg6: memref<8x1xf32, #tpu.memory_space<vmem>>, %arg7: memref<8x8xf32, #tpu.memory_space<vmem>>, %arg8: memref<8x1xf32, #tpu.memory_space<vmem>>, %arg9: memref<1x8x256xf32, #tpu.memory_space<vmem>>) attributes {dimension_semantics = [#tpu.dimension_semantics<parallel>, #tpu.dimension_semantics<parallel>], iteration_bounds = array<i64: 2, 1>, scalar_prefetch = 0 : i64, scratch_operands = 0 : i64, tpu.core_type = #tpu.core_type<tc>, window_params = [{transform_indices = @transform_0, window_bounds = array<i64: 1, 4, 256>}, {pipeline_mode = #tpu.pipeline_mode<synchronous>, transform_indices = @transform_1, window_bounds = array<i64: 16, 4>}, {pipeline_mode = #tpu.pipeline_mode<synchronous>, transform_indices = @transform_2, window_bounds = array<i64: 16, 1>}, {pipeline_mode = #tpu.pipeline_mode<synchronous>, transform_indices = @transform_3, window_bounds = array<i64: 8, 8>}, {pipeline_mode = #tpu.pipeline_mode<synchronous>, transform_indices = @transform_4, window_bounds = array<i64: 8, 1>}, {pipeline_mode = #tpu.pipeline_mode<synchronous>, transform_indices = @transform_5, window_bounds = array<i64: 8, 8>}, {pipeline_mode = #tpu.pipeline_mode<synchronous>, transform_indices = @transform_6, window_bounds = array<i64: 8, 1>}, {transform_indices = @transform_7, window_bounds = array<i64: 1, 8, 256>}]} {
    %c0 = arith.constant 0 : index
    %c0_0 = arith.constant 0 : index
    %c0_1 = arith.constant 0 : index
    %0 = vector.load %arg2[%c0, %c0_0, %c0_1] : memref<1x4x256xf32, #tpu.memory_space<vmem>>, vector<1x4x256xf32>
    %1 = vector.shape_cast %0 : vector<1x4x256xf32> to vector<4x256xf32>
    %c0_2 = arith.constant 0 : index
    %c0_3 = arith.constant 0 : index
    %2 = vector.load %arg3[%c0_2, %c0_3] : memref<16x4xf32, #tpu.memory_space<vmem>>, vector<16x4xf32>
    %cst = arith.constant dense<0.000000e+00> : vector<16x256xf32>
    %3 = tpu.matmul %2, %1, %cst {dimension_numbers = #tpu.dot_dimension_numbers<[1], [0], [0], [1], [0, 0, 1, 1], [], []>} : vector<16x4xf32>, vector<4x256xf32>, vector<16x256xf32> -> vector<16x256xf32>
    %c0_4 = arith.constant 0 : index
    %c0_5 = arith.constant 0 : index
    %4 = vector.load %arg4[%c0_4, %c0_5] : memref<16x1xf32, #tpu.memory_space<vmem>>, vector<16x1xf32>
    %5 = vector.broadcast %4 : vector<16x1xf32> to vector<16x256xf32>
    %6 = arith.addf %3, %5 : vector<16x256xf32>
    %7 = vector.extract_strided_slice %6 {offsets = [0, 0], sizes = [8, 256], strides = [1, 1]} : vector<16x256xf32> to vector<8x256xf32>
    %cst_6 = arith.constant 0.000000e+00 : f32
    %8 = vector.broadcast %cst_6 : f32 to vector<8x256xf32>
    %9 = arith.maximumf %7, %8 : vector<8x256xf32>
    %10 = vector.extract_strided_slice %6 {offsets = [8, 0], sizes = [8, 256], strides = [1, 1]} : vector<16x256xf32> to vector<8x256xf32>
    %c0_7 = arith.constant 0 : index
    %c0_8 = arith.constant 0 : index
    %11 = vector.load %arg5[%c0_7, %c0_8] : memref<8x8xf32, #tpu.memory_space<vmem>>, vector<8x8xf32>
    %cst_9 = arith.constant dense<0.000000e+00> : vector<8x256xf32>
    %12 = tpu.matmul %11, %9, %cst_9 {dimension_numbers = #tpu.dot_dimension_numbers<[1], [0], [0], [1], [0, 0, 1, 1], [], []>} : vector<8x8xf32>, vector<8x256xf32>, vector<8x256xf32> -> vector<8x256xf32>
    %c0_10 = arith.constant 0 : index
    %c0_11 = arith.constant 0 : index
    %13 = vector.load %arg6[%c0_10, %c0_11] : memref<8x1xf32, #tpu.memory_space<vmem>>, vector<8x1xf32>
    %14 = vector.broadcast %13 : vector<8x1xf32> to vector<8x256xf32>
    %15 = arith.addf %12, %14 : vector<8x256xf32>
    %cst_12 = arith.constant 0.000000e+00 : f32
    %16 = vector.broadcast %cst_12 : f32 to vector<8x256xf32>
    %17 = arith.maximumf %15, %16 : vector<8x256xf32>
    %c0_13 = arith.constant 0 : index
    %c0_14 = arith.constant 0 : index
    %18 = vector.load %arg7[%c0_13, %c0_14] : memref<8x8xf32, #tpu.memory_space<vmem>>, vector<8x8xf32>
    %cst_15 = arith.constant dense<0.000000e+00> : vector<8x256xf32>
    %19 = tpu.matmul %18, %17, %cst_15 {dimension_numbers = #tpu.dot_dimension_numbers<[1], [0], [0], [1], [0, 0, 1, 1], [], []>} : vector<8x8xf32>, vector<8x256xf32>, vector<8x256xf32> -> vector<8x256xf32>
    %c0_16 = arith.constant 0 : index
    %c0_17 = arith.constant 0 : index
    %20 = vector.load %arg8[%c0_16, %c0_17] : memref<8x1xf32, #tpu.memory_space<vmem>>, vector<8x1xf32>
    %21 = vector.broadcast %20 : vector<8x1xf32> to vector<8x256xf32>
    %22 = arith.addf %19, %21 : vector<8x256xf32>
    %23 = arith.addf %10, %22 : vector<8x256xf32>
    %c0_18 = arith.constant 0 : index
    %c0_19 = arith.constant 0 : index
    %c0_20 = arith.constant 0 : index
    %24 = vector.load %arg9[%c0_18, %c0_19, %c0_20] : memref<1x8x256xf32, #tpu.memory_space<vmem>>, vector<1x8x256xf32>
    %25 = vector.shape_cast %24 : vector<1x8x256xf32> to vector<8x256xf32>
    %26 = vector.shape_cast %23 : vector<8x256xf32> to vector<1x8x256xf32>
    tpu.vector_store %arg9[%c0_18, %c0_19, %c0_20], %26 {strides = array<i32>} : memref<1x8x256xf32, #tpu.memory_space<vmem>>, vector<1x8x256xf32>,
    return
  }
  func.func @transform_0(%arg0: i32, %arg1: i32) -> (i32, i32, i32) {
    %c0_i32 = arith.constant 0 : i32
    %c0_i32_0 = arith.constant 0 : i32
    return %arg0, %c0_i32, %arg1 : i32, i32, i32
  }
  func.func @transform_1(%arg0: i32, %arg1: i32) -> (i32, i32) {
    %c0_i32 = arith.constant 0 : i32
    %c0_i32_0 = arith.constant 0 : i32
    %c0_i32_1 = arith.constant 0 : i32
    return %c0_i32, %c0_i32_0 : i32, i32
  }
  func.func @transform_2(%arg0: i32, %arg1: i32) -> (i32, i32) {
    %c0_i32 = arith.constant 0 : i32
    %c0_i32_0 = arith.constant 0 : i32
    %c0_i32_1 = arith.constant 0 : i32
    return %c0_i32, %c0_i32_0 : i32, i32
  }
  func.func @transform_3(%arg0: i32, %arg1: i32) -> (i32, i32) {
    %c0_i32 = arith.constant 0 : i32
    %c0_i32_0 = arith.constant 0 : i32
    %c0_i32_1 = arith.constant 0 : i32
    return %c0_i32, %c0_i32_0 : i32, i32
  }
  func.func @transform_4(%arg0: i32, %arg1: i32) -> (i32, i32) {
    %c0_i32 = arith.constant 0 : i32
    %c0_i32_0 = arith.constant 0 : i32
    %c0_i32_1 = arith.constant 0 : i32
    return %c0_i32, %c0_i32_0 : i32, i32
  }
  func.func @transform_5(%arg0: i32, %arg1: i32) -> (i32, i32) {
    %c0_i32 = arith.constant 0 : i32
    %c0_i32_0 = arith.constant 0 : i32
    %c0_i32_1 = arith.constant 0 : i32
    return %c0_i32, %c0_i32_0 : i32, i32
  }
  func.func @transform_6(%arg0: i32, %arg1: i32) -> (i32, i32) {
    %c0_i32 = arith.constant 0 : i32
    %c0_i32_0 = arith.constant 0 : i32
    %c0_i32_1 = arith.constant 0 : i32
    return %c0_i32, %c0_i32_0 : i32, i32
  }
  func.func @transform_7(%arg0: i32, %arg1: i32) -> (i32, i32, i32) {
    %c0_i32 = arith.constant 0 : i32
    %c0_i32_0 = arith.constant 0 : i32
    return %arg0, %c0_i32, %arg1 : i32, i32, i32
  }
}

</mosaic_0001>

<bundles_post_ra>
// kernel: tpu_custom_call.1
= control target key start
LH: loop header
LB: loop body
LE: loop exit
PB: predicated region body
PF: predicated region fallthrough
CT: control target
= control target key end

     0   :  { %12 = vsyncpa [#allocation3], 0  ;;  %s1028_s0 = inlined_call_operand.vmem [shape: f32[2,4,256], index: 0, kind: input, shape index: {}]   ;;  %s1029_s1 = inlined_call_operand.vmem [shape: f32[16,4], index: 1, kind: input, shape index: {}]   ;;  %s1030_s2 = inlined_call_operand.vmem [shape: f32[16,1], index: 2, kind: input, shape index: {}]   ;;  %s1031_s3 = inlined_call_operand.vmem [shape: f32[8,8], index: 3, kind: input, shape index: {}]   ;;  %s1032_s4 = inlined_call_operand.vmem [shape: f32[8,1], index: 4, kind: input, shape index: {}]   ;;  %s1033_s5 = inlined_call_operand.vmem [shape: f32[8,8], index: 5, kind: input, shape index: {}]   ;;  %s1034_s6 = inlined_call_operand.vmem [shape: f32[8,1], index: 6, kind: input, shape index: {}]   ;;  %s1035_s7 = inlined_call_operand.hbm [shape: f32[2,8,256], index: 7, kind: output, shape index: {}]  }
   0x1   :  { %14 = vsyncpa [#allocation3 + $0x1], 0  ;;  %s890_s24 = smov 0   ;;  %s892_s25 = smov 0  }
   0x2   :  { %s894_s26 = smov 0   ;;  %s896_s27 = smov 0  }
   0x3   :  { %s898_s28 = smov 0   ;;  %s900_s29 = smov 0  }
   0x4 LB: > { %s678_s30 = sadd.s32 4294967295, %s845_s29   ;;  %s679_s8 = sadd.s32 4294967294, %s845_s29   ;;  %s845_s29 = sphi %s900_s29, %s20_s29   ;;  %s841_s28 = sphi %s898_s28, %s1042_s28   ;;  %s837_s27 = sphi %s896_s27, %s1041_s27   ;;  %s833_s26 = sphi %s894_s26, %s1040_s26   ;;  %s829_s25 = sphi %s892_s25, %s1039_s25   ;;  %s825_s24 = sphi %s890_s24, %s1038_s24  }
   0x5   : > { %s32_s9 = sadd.s32 1, %s841_s28  ;;  %s195_s10 = sadd.s32 1, %s833_s26 }
   0x6   : > { %p34_p0 = scmp.ge.s32.totalorder %s32_s9, 2  ;;  %p205_p1 = scmp.ne.s32.totalorder %s833_s26, %s829_s25 }
   0x7   : > { %p206_p2 = scmp.eq.s32.totalorder %s678_s30, 1  ;;  %p211_p3 = scmp.ne.s32.totalorder %s829_s25, %s825_s24 }
   0x8   : > { %s1044_s9 = smov (%p34_p0, %s32_s9), 0  ;;  %p212_p5 = scmp.eq.s32.totalorder %s679_s8, 1 }
   0x9   : > { %p930_p4 = por %p206_p2, %p205_p1  ;;  %s190_s12 = ssub.s32 %s841_s28, %s1044_s9 }
   0xa   : > { %p682_p6 = scmp.ge.s32.totalorder %s845_s29, 1  ;;  %p193_p7 = scmp.eq.s32.totalorder %s190_s12, 0 }
   0xb   : > { %p937_p8 = por %p212_p5, %p211_p3  ;;  %p261_p9 = scmp.lt.s32.totalorder %s845_s29, 3 }
   0xc   : > { %s943_s14 = scalar_select %p193_p7, %s833_s26, %s195_s10  }
   0xd   : > { %p262_p10 = pnand %p682_p6, %p261_p9 }
   0xe   : > { %p298_p11 = scmp.lt.s32.totalorder (!%p262_p10), %s837_s27, 1  ;;  %v847_v0 = vmov (!%p262_p10), 0.0   ;;  %v848_v1 = vmov (!%p262_p10), 0   ;;  %v311_v2 = vld [vmem:[%s1030_s2] sm:$0xff] (!%p262_p10)  ;;  %vm332_vm0 = vcmask (!%p262_p10), 1043456   ;;  %vm325_vm1 = vcmask (!%p262_p10), 31744  }
   0xf   : > { %265 = sbr.rel (%p262_p10) target bundleno = 698 (0x2ba), region = 48  ;;  %401 = vmatprep.mubr.f32.mxu0 (!%p262_p10), %v847_v0  ;;  %764 = vset.pattern.permute.xlu0 (!%p262_p10), %v848_v1  ;;  %v417_v3 = vld [vmem:[%s1032_s4] sm:$0xff] (!%p262_p10)  ;;  %v310_v7 = vld [vmem:[%s1029_s1 + $0x8] sm:$0xff] (!%p262_p10)  ;;  %vm423_vm2 = vcmask (!%p262_p10), 64512   ;;  %s698_s8 = sshll.u32 (!%p262_p10), %s837_s27, 8 }
  0x10   : > { %315 = vperm.xlu0 (!%p262_p10), %764, %v311_v2   ;;  %407 = vmatprep.mubr.f32.mxu1 (!%p262_p10), %v847_v0  ;;  %v309_v6 = vld [vmem:[%s1029_s1] sm:$0xff] (!%p262_p10)  ;;  %v312_v8 = vld [vmem:[%s1030_s2 + $0x8] sm:$0xff] (!%p262_p10)  ;;  %s849_s19 = smov (!%p262_p10), [#allocation2]  }
  0x11   : > { %765 = vset.pattern.permute.xlu1 (!%p262_p10), %v848_v1  ;;  %v501_v9 = vld [vmem:[%s1034_s6] sm:$0xff] (!%p262_p10) }
  0x12   : > { %320 = vperm.xlu1 (!%p262_p10), %765, %v312_v8   ;;  %v416_v17 = vld [vmem:[%s1031_s3] sm:$0xff] (!%p262_p10) }
  0x13   : > { %v500_v27 = vld [vmem:[%s1033_s5] sm:$0xff] (!%p262_p10) }
  0x14   : > { %420 = vperm.xlu0 (!%p262_p10), %764, %v417_v3  }
  0x16   : > { %s299_s17 = scalar_select %p298_p11, %s837_s27, 1  ;;  %504 = vperm.xlu1 %765, %v501_v9  }
  0x18   : > { %s697_s20 = sshll.u32 %s299_s17, 3  ;;  %s981_s17 = scalar_lea.hbm %s1035_s7, %s698_s8 }
  0x19   : > { %s305_s23 = scalar_lea.vmem %s1028_s0, %s697_s20  ;;  %s771_s20 = sshll.u32 %s849_s19, 4  ;;  %s772_s20 = int_to_ptr.vmem [resolvable:$false] %s771_s20 }
  0x1a   : > { %v308_v4 = vld [vmem:[%s305_s23] sm:$0xff]  ;;  %s294_s23 = sand.u32 1, %s829_s25   ;;  %s773_s21 = scalar_lea.vmem %s772_s20, 512 }
  0x1b   : > { %v324_v5 = vcombine.high %v308_v4, %v308_v4  ;;  %s683_s30 = sshll.u32 %s294_s23, 4  ;;  %s586_s27 = scalar_lea.sflag [#allocation3], %s294_s23 }
  0x1c   : > { %s296_s10 = scalar_lea.vmem [#allocation2], %s683_s30 }
  0x1d   : > { %686 = vmatprep.subr.msk.mxu0 %vm332_vm0, %v324_v5  ;;  %699 = vmatprep.subr.msk.mxu1 %vm332_vm0, %v324_v5  ;;  %s602_s12 = sshll.u32 %s296_s10, 4  ;;  %s983_s12 = int_to_ptr.vmem [resolvable:$true] %s602_s12 }
  0x1e   : > { %687 = vmatpush1.msk.msra.mxu0 %vm332_vm0, %v308_v4  ;;  %700 = vmatpush1.msk.msra.mxu1 %vm332_vm0, %v308_v4  ;;  %s767_s18 = scalar_lea.vmem %s983_s12, 256  ;;  %p774_p1 = scmp.lt.s32.totalorder %s983_s12, %s772_s20 }
  0x1f   : > { %688 = vmatmul.mubr.msk.f32.vlgmr.msra.gmra.mrb[0].mxu0 %vm325_vm1, %v309_v6  ;;  %689 = vmatmul.mubr.msk.f32.vlgmr.msra.gmra.mrb[0].mxu1 %vm325_vm1, %v310_v7  ;;  %p768_p12 = scmp.ne.s32.totalorder %s983_s12, %s767_s18  ;;  %p775_p2 = scmp.lt.s32.totalorder %s773_s21, %s767_s18 }
  0x20   : > { %574 = vmatprep.mubr.f32.mxu0 %v847_v0  ;;  %491 = vmatprep.mubr.f32.mxu1 %v847_v0 }
  0x21   : > { %p769_p13 = pnand %p768_p12, %p930_p4  ;;  %p776_p3 = por %p775_p2, %p774_p1 }
  0x23   : > { %p770_p0 = pneg %p769_p13 }
  0x25   : > { %p777_p5 = pnand %p776_p3, %p770_p0 }
  0x8f   : > { %v316_v10 = vpop.permute.xlu0 %315 }
  0x91   : > { %v321_v28 = vpop.permute.xlu1 %320 }
  0x93   : > { %v421_v20 = vpop.permute.xlu0 %420 }
  0x95   : > { %v505_v31 = vpop.permute.xlu1 %504 }
  0xf2   : > { %v403_v11 = vpop.f32.mrb[0].mxu0  ;;  %v409_v18 = vpop.f32.mrb[0].mxu1 }
  0xf3   : > { %v404_v12 = vadd.f32 %v403_v11, %v316_v10  ;;  %v405_v13 = vpop.f32.mrb[1].mxu0  ;;  %v411_v19 = vpop.f32.mrb[1].mxu1  ;;  %v410_v29 = vadd.f32 %v409_v18, %v321_v28 }
  0xf4   : > { %v406_v14 = vadd.f32 %v405_v13, %v316_v10  ;;  %v412_v30 = vadd.f32 %v411_v19, %v321_v28 }
  0xf5   : > { %v414_v16 = vmax.f32 %v404_v12, 0.0  ;;  %v702_v32 = vadd.f32 %v505_v31, %v410_v29 }
  0xf6   : > { %v415_v15 = vmax.f32 %v406_v14, 0.0  ;;  %v705_v33 = vadd.f32 %v505_v31, %v412_v30 }
  0xf8   : > { %427 = vmatprep.subr.mxu1 %v415_v15 }
  0xf9   : > { %428 = vmatpush1.msra.mxu1 %v414_v16 }
  0xfa   : > { %690 = vmatmul.mubr.msk.f32.vlgmr.msra.gmra.mrb[2].mxu1 %vm423_vm2, %v416_v17 }
 0x1cd   : > { %v493_v21 = vpop.f32.mrb[2].mxu1 }
 0x1ce   : > { %v494_v22 = vadd.f32 %v493_v21, %v421_v20  ;;  %v495_v23 = vpop.f32.mrb[3].mxu1 }
 0x1cf   : > { %v496_v24 = vadd.f32 %v495_v23, %v421_v20 }
 0x1d0   : > { %v498_v26 = vmax.f32 %v494_v22, 0.0 }
 0x1d1   : > { %v499_v25 = vmax.f32 %v496_v24, 0.0 }
 0x1d3   : > { %510 = vmatprep.subr.mxu0 %v499_v25 }
 0x1d4   : > { %511 = vmatpush1.msra.mxu0 %v498_v26 }
 0x1d5   : > { %691 = vmatmul.mubr.msk.f32.vlgmr.msra.gmra.mrb[2].mxu0 %vm423_vm2, %v500_v27 }
 0x2a8   : > { %v576_v34 = vpop.f32.mrb[2].mxu0 }
 0x2a9   : > { %v703_v35 = vadd.f32 %v702_v32, %v576_v34  ;;  %v578_v36 = vpop.f32.mrb[3].mxu0 }
 0x2aa   : > { %v706_v37 = vadd.f32 %v705_v33, %v578_v36 }
 0x2ab   : > { %583 = vst [vmem:[%s296_s10] sm:$0xff] %v703_v35 }
 0x2ac   : > { %584 = vst [vmem:[%s296_s10 + $0x8] sm:$0xff] %v706_v37 }
 0x2ad   : > { %780 = shalt.err (!%p777_p5)
}
 0x2ae   : > { %s781_s22 = scalar_lea.hbm %s981_s17, 256  ;;  %s785_s8 = scalar_lea.hbm %s1035_s7, 512 }
 0x2af   : > { %p782_p6 = scmp.ne.s32.totalorder %s981_s17, %s781_s22  ;;  %p786_p10 = scmp.lt.u32.totalorder %s981_s17, %s1035_s7 }
 0x2b0   : > { %p787_p11 = scmp.lt.u32.totalorder %s785_s8, %s781_s22  ;;  %p789_p13 = scmp.lt.u32.totalorder %s781_s22, %s981_s17 }
 0x2b1   : > { %p783_p7 = pnand %p782_p6, %p930_p4 }
 0x2b2   : > { %p788_p12 = por %p787_p11, %p786_p10 }
 0x2b3   : > { %p784_p9 = pneg %p783_p7 }
 0x2b4   : > { %p790_p0 = por %p789_p13, %p788_p12 }
 0x2b6   : > { %p791_p1 = pnand %p790_p0, %p784_p9 }
 0x2b8   : > { %794 = shalt.err (!%p791_p1)
}
 0x2b9   : > { %707 = dma.vmem_to_hbm [thread:$0]  (%p930_p4), %s983_s12, 256, %s981_s17, %s586_s27  }
 0x2ba PF: > { %p713_p2 = scmp.ge.s32.totalorder %s845_s29, 2  ;;  %s614_s16 = sand.u32 1, %s825_s24  }
 0x2bb   : > { %s615_s18 = scalar_lea.sflag [#allocation3], %s614_s16 }
 0x2bc   : > { %p710_p3 = pnand %p713_p2, %p937_p8 }
 0x2be   : > { %820 = dma.done.wait (!%p710_p3), %s615_s18, 256  }
 0x2bf   : > { %822 = vsyncadd (!%p710_p3), %s615_s18, 4294967040  ;;  %s20_s29 = sadd.s32 1, %s845_s29   ;;  %s1038_s24 = smov %s829_s25 }
 0x2c0   : > { %p17_p5 = scmp.ge.s32.totalorder %s20_s29, 4   ;;  %s1039_s25 = smov %s833_s26 }
 0x2c1   : > { %s1040_s26 = smov %s943_s14  ;;  %s1041_s27 = smov %s841_s28 }
 0x2c2   : > { %s1042_s28 = smov %s1044_s9  ;;  %19 = sbr.rel (!%p17_p5) target bundleno = 4 (0x4), region = 83 }
 0x2c9   :  { %620 = vsyncpa [#allocation3], 1 }
 0x2ca   :  { %622 = vsyncpa [#allocation3 + $0x1], 1 }

</bundles_post_ra>
